<compile_context>
chip_gen: v7x
topology: tpu7x:2x2x1
jax: 0.10.0
libtpu: 0.0.40
codegen_flags: <defaults>
</compile_context>

<pallas_src>
import jax
import jax.numpy as jnp
from jax.experimental import pallas as pl
from jax.experimental.pallas import tpu as pltpu

LATENT_DIM = 8                         # latent_dim[0]
IN_CH = 128                            # fixed by nn.Conv2d(128, 2*latent_dim, (1, 1))
LANES = 128
ACT_VMEM_BUDGET = 16 * 1024 * 1024     # streamed-activation buffer budget (all gens)
MAX_CHUNK = 16384                      # lane cap even when the byte budget allows more
VMEM_LIMIT_BYTES = 32 * 1024 * 1024    # > v5e 16 MiB scoped default, <= v7x 64 MiB physical
PIPELINE_BUFFERS = 3


def _make_kernel(n_inputs, latent_dim, chunk, s_valid, num_chunks, inv_total):
    """Builds a kernel for `n_inputs` flattened [C, S] activations."""
    two_l = 2 * latent_dim
    aligned = (chunk % LANES) == 0
    needs_mask = (num_chunks > 1) and (s_valid % chunk != 0)
    rem = s_valid - (num_chunks - 1) * chunk   # valid lanes in the final chunk (static)

    def kernel(*refs):
        x_refs = refs[:n_inputs]
        wt_ref = refs[n_inputs]          # [C, 2L]  (1x1 conv weight, pre-transposed)
        b_ref = refs[n_inputs + 1]       # [1, 2L]
        out_ref = refs[n_inputs + 2]     # [1, 2L]
        acc_ref = refs[n_inputs + 3]     # [C, 128] f32 lane-wise accumulator

        step = pl.program_id(0)
        last = num_chunks - 1

        @pl.when(step == 0)
        def _init():
            acc_ref[...] = jnp.zeros_like(acc_ref)

        def accumulate(n_full, tail):
            # n_full aligned 128-lane slices (pure same-lane VPU adds; per-slice
            # loads keep the live vreg set tiny) + at most one lane-masked tail slice.
            partial = None
            lane = None
            if tail:
                lane = jax.lax.broadcasted_iota(jnp.int32, (1, LANES), 1)
            for x_ref in x_refs:
                for j in range(n_full):
                    sl = x_ref[:, j * LANES:(j + 1) * LANES].astype(jnp.float32)
                    partial = sl if partial is None else partial + sl
                if tail:
                    sl = x_ref[:, n_full * LANES:(n_full + 1) * LANES].astype(jnp.float32)
                    sl = jnp.where(lane < tail, sl, 0.0)
                    partial = sl if partial is None else partial + sl
            acc_ref[...] += partial

        def accumulate_unaligned():
            # Single-chunk case with S not a multiple of 128: one-off XLU lane reduce.
            total = None
            for x_ref in x_refs:
                p = jnp.sum(x_ref[...].astype(jnp.float32), axis=-1, keepdims=True)
                total = p if total is None else total + p
            lane = jax.lax.broadcasted_iota(jnp.int32, (1, LANES), 1)
            acc_ref[...] += jnp.where(lane == 0, total, 0.0)

        if not aligned:
            accumulate_unaligned()
        elif needs_mask:
            # Mask work only runs on the final grid step; every other step is
            # unmasked full-width adds (keeps the steady state pure DMA-bound).
            @pl.when(step < last)
            def _full_steps():
                accumulate(chunk // LANES, 0)

            @pl.when(step == last)
            def _tail_step():
                accumulate(rem // LANES, rem % LANES)
        else:
            accumulate(chunk // LANES, 0)

        @pl.when(step == last)
        def _finalize():
            # Single cross-lane reduce + both torch.mean calls fused into one scale.
            pooled = jnp.sum(acc_ref[...], axis=-1, keepdims=True) * inv_total   # [C, 1]
            # 1x1 conv on the pooled [C,1,1] map == [1,C] @ [C,2L]; expressed as a
            # broadcast multiply + cross-sublane reduce -> lane-dense (1, 2L) output.
            mls = jnp.sum(pooled * wt_ref[...], axis=0, keepdims=True) + b_ref[...]
            col = jax.lax.broadcasted_iota(jnp.int32, (1, two_l), 1)
            # cols [:L] = mu, cols [L:] = sigma = exp(log_sigma)
            out_ref[...] = jnp.where(col < latent_dim, mls, jnp.exp(mls))

    return kernel


def _activation_spec(c, chunk, multibuffer):
    if multibuffer:
        try:
            return pl.BlockSpec((c, chunk), lambda i: (0, i),
                                pipeline_mode=pl.Buffered(PIPELINE_BUFFERS))
        except TypeError:
            pass  # BlockSpec without pipeline_mode support: default 2-deep pipelining.
    return pl.BlockSpec((c, chunk), lambda i: (0, i))


def axis_aligned_conv_gaussian(x, conv_weight, conv_bias, segm=None,
                               latent_dim=LATENT_DIM, chunk_cap=None):
    """Forward pass of AxisAlignedConvGaussian.

    Args:
      x: [C, H, W] activation (f32 or bf16; reduction accumulates in f32).
      conv_weight: [2L, C] or [2L, C, 1, 1] (nn.Conv2d 1x1 weight layout).
      conv_bias: [2L].
      segm: optional [C, H, W]; mirrors torch.cat((input, segm), dim=1) on a CHW
        tensor (concatenation along H), which only affects the spatial mean.
      chunk_cap: optional override of the spatial lane-chunk (testing / tuning).

    Returns:
      (mu, sigma): each [latent_dim] f32 — the parameters of
      Independent(Normal(mu, sigma), 1).
    """
    two_l = 2 * latent_dim
    w = jnp.asarray(conv_weight, jnp.float32).reshape(two_l, -1)   # [2L, C]
    wt = w.T                                                       # [C, 2L]
    b = jnp.asarray(conv_bias, jnp.float32).reshape(1, two_l)      # [1, 2L]

    c, h, width = x.shape
    if w.shape[1] != c:
        raise ValueError(f"conv weight expects {w.shape[1]} channels, got {c}")

    # Lane-dense flatten (free: contiguous reshape, no HBM copy).
    inputs = [x.reshape(c, h * width)]
    if segm is not None:
        # TODO(synk): torch.cat(dim=1) only requires matching C and W; we currently
        # require identical (H, W) so both inputs share one spatial chunking grid.
        if segm.shape != x.shape:
            raise NotImplementedError("segm must have the same shape as x")
        inputs.append(segm.reshape(c, h * width))

    s = h * width
    n_in = len(inputs)
    inv_total = 1.0 / float(n_in * s)      # mean over concatenated-H then W

    # Bytes-driven chunk: largest 128-multiple lane tile such that all streamed
    # activation buffers (n_in inputs x PIPELINE_BUFFERS deep) fit the budget.
    itemsize = jnp.dtype(x.dtype).itemsize
    if chunk_cap is None:
        cap = ACT_VMEM_BUDGET // (n_in * PIPELINE_BUFFERS * c * itemsize)
        cap = max(LANES, (cap // LANES) * LANES)
        cap = min(cap, MAX_CHUNK)
    else:
        cap = max(LANES, (int(chunk_cap) // LANES) * LANES)
    chunk = s if s <= cap else cap
    num_chunks = pl.cdiv(s, chunk)

    kernel = _make_kernel(n_in, latent_dim, chunk, s, num_chunks, inv_total)

    multibuffer = num_chunks >= PIPELINE_BUFFERS
    in_specs = [_activation_spec(c, chunk, multibuffer) for _ in range(n_in)]
    in_specs += [
        pl.BlockSpec((c, two_l), lambda i: (0, 0)),    # weight: resident, fetched once
        pl.BlockSpec((1, two_l), lambda i: (0, 0)),    # bias
    ]
    out_spec = pl.BlockSpec((1, two_l), lambda i: (0, 0))

    cost = pl.CostEstimate(
        flops=n_in * c * s + 2 * two_l * c,
        transcendentals=two_l,
        bytes_accessed=n_in * c * s * itemsize + (c * two_l + two_l) * 4 + two_l * 4,
    )

    mls = pl.pallas_call(
        kernel,
        out_shape=jax.ShapeDtypeStruct((1, two_l), jnp.float32),
        grid_spec=pltpu.PrefetchScalarGridSpec(
            num_scalar_prefetch=0,
            grid=(num_chunks,),
            in_specs=in_specs,
            out_specs=out_spec,
            scratch_shapes=[pltpu.VMEM((c, LANES), jnp.float32)],
        ),
        compiler_params=pltpu.CompilerParams(
            dimension_semantics=("arbitrary",),        # reduction axis into scratch/output
            vmem_limit_bytes=VMEM_LIMIT_BYTES),
        cost_estimate=cost,
    )(*inputs, wt, b)

    mls = mls.reshape(two_l)
    # TODO(synk): torch.distributions Independent(Normal(mu, sigma), 1) has no
    # JAX-array equivalent; we return its (loc, scale) parameters.
    return mls[:latent_dim], mls[latent_dim:]


if __name__ == "__main__":
    key = jax.random.PRNGKey(0)
    kx, ks, kw, kb, k1, k2, k3, k4 = jax.random.split(key, 8)

    C, H, W = IN_CH, 16, 16
    L = LATENT_DIM

    x = jax.random.normal(kx, (C, H, W), dtype=jnp.float32)
    segm = jax.random.normal(ks, (C, H, W), dtype=jnp.float32)

    # Deterministic param init matching __init__:
    #   kaiming_normal_(weight, mode='fan_in', nonlinearity='relu') -> std = sqrt(2/fan_in)
    #   normal_(bias) -> N(0, 1)
    fan_in = C * 1 * 1
    w_std = (2.0 / fan_in) ** 0.5
    conv_weight = w_std * jax.random.normal(kw, (2 * L, C, 1, 1), dtype=jnp.float32)
    conv_bias = jax.random.normal(kb, (2 * L,), dtype=jnp.float32)
    w2d = conv_weight.reshape(2 * L, C)

    def ref(xin, seg=None):
        xin = jnp.asarray(xin, jnp.float32)
        if seg is not None:
            xin = jnp.concatenate([xin, jnp.asarray(seg, jnp.float32)], axis=1)
        pooled = xin.mean(axis=(1, 2))                  # [C]
        mls = w2d @ pooled + conv_bias                  # [2L]
        return mls[:L], jnp.exp(mls[L:])

    def check(got, want, tol=1e-4):
        gm, gs = got
        wm, ws = want
        assert jnp.allclose(gm, wm, rtol=tol, atol=tol), (gm, wm)
        assert jnp.allclose(gs, ws, rtol=tol, atol=tol), (gs, ws)

    # 1. Prior and posterior at the module's default shapes (single-chunk path).
    out_prior = axis_aligned_conv_gaussian(x, conv_weight, conv_bias)
    out_post = axis_aligned_conv_gaussian(x, conv_weight, conv_bias, segm=segm)
    jax.block_until_ready((out_prior, out_post))
    check(out_prior, ref(x))
    check(out_post, ref(x, segm))

    # 2. S not a multiple of 128 (single-chunk unaligned lane-reduce path).
    x_odd = jax.random.normal(k1, (C, 10, 30), dtype=jnp.float32)       # S = 300
    out_odd = axis_aligned_conv_gaussian(x_odd, conv_weight, conv_bias)
    jax.block_until_ready(out_odd)
    check(out_odd, ref(x_odd))

    # 3. Multi-chunk, even division (chunk_cap override keeps test shapes small).
    x_even = jax.random.normal(k2, (C, 16, 64), dtype=jnp.float32)      # S = 1024 -> 4 x 256
    out_even = axis_aligned_conv_gaussian(x_even, conv_weight, conv_bias, chunk_cap=256)
    jax.block_until_ready(out_even)
    check(out_even, ref(x_even))

    # 4. Multi-chunk ragged tail with lane mask; prior and posterior (two streamed inputs).
    x_rag = jax.random.normal(k3, (C, 10, 70), dtype=jnp.float32)       # S = 700 -> 256,256,188
    s_rag = jax.random.normal(k4, (C, 10, 70), dtype=jnp.float32)
    out_rag = axis_aligned_conv_gaussian(x_rag, conv_weight, conv_bias, chunk_cap=256)
    out_rag_post = axis_aligned_conv_gaussian(x_rag, conv_weight, conv_bias,
                                              segm=s_rag, chunk_cap=256)
    jax.block_until_ready((out_rag, out_rag_post))
    check(out_rag, ref(x_rag))
    check(out_rag_post, ref(x_rag, s_rag))

    # 5. bf16 activations (f32 accumulation in-kernel; byte budget doubles the chunk).
    x_bf = x.astype(jnp.bfloat16)
    s_bf = segm.astype(jnp.bfloat16)
    out_bf = axis_aligned_conv_gaussian(x_bf, conv_weight, conv_bias, segm=s_bf)
    jax.block_until_ready(out_bf)
    check(out_bf, ref(x_bf, s_bf), tol=5e-3)

    print("KERNEL_OK")
</pallas_src>

<mosaic_0001>
module attributes {stable_mosaic.version = 11 : i64} {
  func.func @kernel(%arg0: i32, %arg1: memref<128x256xf32, #tpu.memory_space<vmem>>, %arg2: memref<128x16xf32, #tpu.memory_space<vmem>>, %arg3: memref<1x16xf32, #tpu.memory_space<vmem>>, %arg4: memref<1x16xf32, #tpu.memory_space<vmem>>, %arg5: memref<128x128xf32, #tpu.memory_space<vmem>>) attributes {dimension_semantics = [#tpu.dimension_semantics<arbitrary>], iteration_bounds = array<i64: 1>, scalar_prefetch = 0 : i64, scratch_operands = 1 : i64, tpu.core_type = #tpu.core_type<tc>, window_params = [{transform_indices = @transform_0, window_bounds = array<i64: 128, 256>}, {pipeline_mode = #tpu.pipeline_mode<synchronous>, transform_indices = @transform_1, window_bounds = array<i64: 128, 16>}, {pipeline_mode = #tpu.pipeline_mode<synchronous>, transform_indices = @transform_2, window_bounds = array<i64: 1, 16>}, {pipeline_mode = #tpu.pipeline_mode<synchronous>, transform_indices = @transform_3, window_bounds = array<i64: 1, 16>}]} {
    %c0_i32 = arith.constant 0 : i32
    %0 = arith.cmpi eq, %arg0, %c0_i32 : i32
    %1 = arith.extui %0 : i1 to i32
    %c0_i32_0 = arith.constant 0 : i32
    %2 = arith.cmpi ne, %1, %c0_i32_0 : i32
    scf.if %2 {
      %cst = arith.constant 0.000000e+00 : f32
      %12 = vector.broadcast %cst : f32 to vector<128x128xf32>
      %c0_9 = arith.constant 0 : index
      %c0_10 = arith.constant 0 : index
      %13 = vector.load %arg5[%c0_9, %c0_10] : memref<128x128xf32, #tpu.memory_space<vmem>>, vector<128x128xf32>
      tpu.vector_store %arg5[%c0_9, %c0_10], %12 {strides = array<i32>} : memref<128x128xf32, #tpu.memory_space<vmem>>, vector<128x128xf32>,
    } else {
    }
    %c0 = arith.constant 0 : index
    %c0_1 = arith.constant 0 : index
    %3 = vector.load %arg1[%c0, %c0_1] : memref<128x256xf32, #tpu.memory_space<vmem>>, vector<128x128xf32>
    %c0_2 = arith.constant 0 : index
    %c128 = arith.constant 128 : index
    %4 = vector.load %arg1[%c0_2, %c128] : memref<128x256xf32, #tpu.memory_space<vmem>>, vector<128x128xf32>
    %5 = arith.addf %3, %4 : vector<128x128xf32>
    %c0_3 = arith.constant 0 : index
    %c0_4 = arith.constant 0 : index
    %6 = vector.load %arg5[%c0_3, %c0_4] : memref<128x128xf32, #tpu.memory_space<vmem>>, vector<128x128xf32>
    %7 = arith.addf %6, %5 : vector<128x128xf32>
    %c0_5 = arith.constant 0 : index
    %c0_6 = arith.constant 0 : index
    %8 = vector.load %arg5[%c0_5, %c0_6] : memref<128x128xf32, #tpu.memory_space<vmem>>, vector<128x128xf32>
    tpu.vector_store %arg5[%c0_5, %c0_6], %7 {strides = array<i32>} : memref<128x128xf32, #tpu.memory_space<vmem>>, vector<128x128xf32>,
    %c0_i32_7 = arith.constant 0 : i32
    %9 = arith.cmpi eq, %arg0, %c0_i32_7 : i32
    %10 = arith.extui %9 : i1 to i32
    %c0_i32_8 = arith.constant 0 : i32
    %11 = arith.cmpi ne, %10, %c0_i32_8 : i32
    scf.if %11 {
      %c0_9 = arith.constant 0 : index
      %c0_10 = arith.constant 0 : index
      %12 = vector.load %arg5[%c0_9, %c0_10] : memref<128x128xf32, #tpu.memory_space<vmem>>, vector<128x128xf32>
      %cst = arith.constant dense<0.000000e+00> : vector<128xf32>
      %13 = vector.multi_reduction <add>, %12, %cst [1] : vector<128x128xf32> to vector<128xf32>
      %14 = vector.shape_cast %13 : vector<128xf32> to vector<128x1xf32>
      %cst_11 = arith.constant 3.906250e-03 : f32
      %15 = vector.broadcast %cst_11 : f32 to vector<128x1xf32>
      %16 = arith.mulf %14, %15 : vector<128x1xf32>
      %c0_12 = arith.constant 0 : index
      %c0_13 = arith.constant 0 : index
      %17 = vector.load %arg2[%c0_12, %c0_13] : memref<128x16xf32, #tpu.memory_space<vmem>>, vector<128x16xf32>
      %18 = vector.broadcast %16 : vector<128x1xf32> to vector<128x16xf32>
      %19 = arith.mulf %18, %17 : vector<128x16xf32>
      %cst_14 = arith.constant dense<0.000000e+00> : vector<16xf32>
      %20 = vector.multi_reduction <add>, %19, %cst_14 [0] : vector<128x16xf32> to vector<16xf32>
      %21 = vector.shape_cast %20 : vector<16xf32> to vector<1x16xf32>
      %c0_15 = arith.constant 0 : index
      %c0_16 = arith.constant 0 : index
      %22 = vector.load %arg3[%c0_15, %c0_16] : memref<1x16xf32, #tpu.memory_space<vmem>>, vector<1x16xf32>
      %23 = arith.addf %21, %22 : vector<1x16xf32>
      %24 = tpu.iota {dimensions = array<i32: 1>} : vector<1x16xi32>
      %c8_i32 = arith.constant 8 : i32
      %25 = vector.broadcast %c8_i32 : i32 to vector<1x16xi32>
      %26 = arith.cmpi slt, %24, %25 : vector<1x16xi32>
      %27 = math.exp %23 : vector<1x16xf32>
      %28 = arith.select %26, %23, %27 : vector<1x16xi1>, vector<1x16xf32>
      %c0_17 = arith.constant 0 : index
      %c0_18 = arith.constant 0 : index
      %29 = vector.load %arg4[%c0_17, %c0_18] : memref<1x16xf32, #tpu.memory_space<vmem>>, vector<1x16xf32>
      tpu.vector_store %arg4[%c0_17, %c0_18], %28 {strides = array<i32>} : memref<1x16xf32, #tpu.memory_space<vmem>>, vector<1x16xf32>,
    } else {
    }
    return
  }
  func.func @transform_0(%arg0: i32) -> (i32, i32) {
    %c0_i32 = arith.constant 0 : i32
    %c0_i32_0 = arith.constant 0 : i32
    return %c0_i32, %arg0 : i32, i32
  }
  func.func @transform_1(%arg0: i32) -> (i32, i32) {
    %c0_i32 = arith.constant 0 : i32
    %c0_i32_0 = arith.constant 0 : i32
    %c0_i32_1 = arith.constant 0 : i32
    return %c0_i32, %c0_i32_0 : i32, i32
  }
  func.func @transform_2(%arg0: i32) -> (i32, i32) {
    %c0_i32 = arith.constant 0 : i32
    %c0_i32_0 = arith.constant 0 : i32
    %c0_i32_1 = arith.constant 0 : i32
    return %c0_i32, %c0_i32_0 : i32, i32
  }
  func.func @transform_3(%arg0: i32) -> (i32, i32) {
    %c0_i32 = arith.constant 0 : i32
    %c0_i32_0 = arith.constant 0 : i32
    %c0_i32_1 = arith.constant 0 : i32
    return %c0_i32, %c0_i32_0 : i32, i32
  }
}

</mosaic_0001>

<bundles_post_ra>
// kernel: tpu_custom_call.1
= control target key start
LH: loop header
LB: loop body
LE: loop exit
PB: predicated region body
PF: predicated region fallthrough
CT: control target
= control target key end

     0   :  { %8 = vsyncpa [#allocation4], 0  ;;  %s476_s0 = inlined_call_operand.hbm [shape: f32[128,256], index: 0, kind: input, shape index: {}]   ;;  %s477_s1 = inlined_call_operand.vmem [shape: f32[128,16], index: 1, kind: input, shape index: {}]   ;;  %s478_s2 = inlined_call_operand.vmem [shape: f32[1,16], index: 2, kind: input, shape index: {}]   ;;  %s479_s3 = inlined_call_operand.hbm [shape: f32[1,16], index: 3, kind: output, shape index: {}]  }
   0x1   :  { %9 = vsyncpa [#allocation5], 0  ;;  %s361_s12 = smov [#allocation3]   ;;  %s313_s16 = scalar_lea.hbm %s476_s0, 4096 }
   0x2   :  { %s15_s13 = sshll.u32 %s361_s12, 4  ;;  %p314_p0 = scmp.ne.s32.totalorder %s476_s0, %s313_s16  ;;  %s16_s13 = int_to_ptr.vmem [resolvable:$true] %s15_s13 }
   0x3   :  { %p317_p1 = scmp.lt.u32.totalorder %s313_s16, %s476_s0 }
   0x5   :  { %p319_p2 = pnand %p317_p1, %p314_p0 }
   0x7   :  { %322 = shalt.err (!%p319_p2)
}
   0x8   :  { %s323_s21 = scalar_lea.vmem %s16_s13, 4096  ;;  %p328_p4 = scmp.lt.s32.totalorder %s16_s13, %s16_s13 }
   0x9   :  { %p324_p3 = scmp.ne.s32.totalorder %s16_s13, %s323_s21  ;;  %p329_p5 = scmp.lt.s32.totalorder %s323_s21, %s323_s21 }
   0xb   :  { %p330_p6 = por %p329_p5, %p328_p4 }
   0xd   :  { %p331_p7 = pnand %p330_p6, %p324_p3 }
   0xf   :  { %334 = shalt.err (!%p331_p7)
}
  0x10   :  { %s362_s22 = smov 256   ;;  %s363_s23 = smov 16  }
  0x11   :  { %21 = dma.hbm_to_vmem [thread:$0]  %s476_s0, 4096, %s16_s13, [#allocation4], %s362_s22, %s362_s22, %s363_s23  }
  0x12   :  { %357 = dma.done.wait [#allocation4], 4096  }
  0x13   :  { %358 = vsyncadd [#allocation4], 4294963200  ;;  %v49_v0 = vld [vmem:[#allocation3] sm:$0xff]  ;;  %v65_v1 = vld [vmem:[#allocation3 + $0x8] sm:$0xff]  ;;  %vm244_vm0 = vcmask 130048   ;;  %s364_s30 = smov [#allocation6]  }
  0x14   :  { %v51_v2 = vld [vmem:[#allocation3 + $0x20] sm:$0xff]  ;;  %v81_v3 = vadd.f32 %v65_v1, %v49_v0  ;;  %v67_v4 = vld [vmem:[#allocation3 + $0x28] sm:$0xff]  ;;  %v50_v5 = vld [vmem:[#allocation3 + $0x10] sm:$0xff]  ;;  %s298_s4 = sshll.u32 %s364_s30, 4  ;;  %vm290_vm2 = vcmask 122880   ;;  %s299_s4 = int_to_ptr.vmem [resolvable:$true] %s298_s4 }
  0x15   :  { %v66_v6 = vld [vmem:[#allocation3 + $0x18] sm:$0xff]  ;;  %v83_v7 = vadd.f32 %v67_v4, %v51_v2  ;;  %v52_v8 = vld [vmem:[#allocation3 + $0x30] sm:$0xff]  ;;  %v53_v12 = vld [vmem:[#allocation3 + $0x40] sm:$0xff]  ;;  %s335_s5 = scalar_lea.vmem %s299_s4, 16  ;;  %s339_s6 = scalar_lea.vmem %s299_s4, 32 }
  0x16   :  { %v68_v9 = vld [vmem:[#allocation3 + $0x38] sm:$0xff]  ;;  %164 = vadd.xlane.f32.xlu0 %v81_v3  ;;  %v82_v10 = vadd.f32 %v66_v6, %v50_v5  ;;  %v69_v13 = vld [vmem:[#allocation3 + $0x48] sm:$0xff]  ;;  %v54_v14 = vld [vmem:[#allocation3 + $0x50] sm:$0xff]  ;;  %p336_p8 = scmp.ne.s32.totalorder %s299_s4, %s335_s5  ;;  %p340_p9 = scmp.lt.s32.totalorder %s299_s4, %s299_s4 }
  0x17   :  { %168 = vadd.xlane.f32.xlu1 %v83_v7  ;;  %v84_v11 = vadd.f32 %v68_v9, %v52_v8  ;;  %v70_v15 = vld [vmem:[#allocation3 + $0x58] sm:$0xff]  ;;  %v85_v16 = vadd.f32 %v69_v13, %v53_v12  ;;  %v55_v18 = vld [vmem:[#allocation3 + $0x60] sm:$0xff]  ;;  %v71_v19 = vld [vmem:[#allocation3 + $0x68] sm:$0xff]  ;;  %p341_p10 = scmp.lt.s32.totalorder %s339_s6, %s335_s5 }
  0x18   :  { %v86_v17 = vadd.f32 %v70_v15, %v54_v14  ;;  %v56_v20 = vld [vmem:[#allocation3 + $0x70] sm:$0xff]  ;;  %v72_v21 = vld [vmem:[#allocation3 + $0x78] sm:$0xff]  ;;  %v87_v22 = vadd.f32 %v71_v19, %v55_v18  ;;  %v57_v24 = vld [vmem:[#allocation3 + $0x80] sm:$0xff] }
  0x19   :  { %v88_v23 = vadd.f32 %v72_v21, %v56_v20  ;;  %v73_v25 = vld [vmem:[#allocation3 + $0x88] sm:$0xff]  ;;  %v58_v26 = vld [vmem:[#allocation3 + $0x90] sm:$0xff]  ;;  %v74_v27 = vld [vmem:[#allocation3 + $0x98] sm:$0xff]  ;;  %p342_p11 = por %p341_p10, %p340_p9 }
  0x1a   :  { %166 = vadd.xlane.f32.xlu0 %v82_v10  ;;  %v89_v28 = vadd.f32 %v73_v25, %v57_v24  ;;  %v90_v29 = vadd.f32 %v74_v27, %v58_v26  ;;  %v59_v30 = vld [vmem:[#allocation3 + $0xa0] sm:$0xff]  ;;  %v75_v31 = vld [vmem:[#allocation3 + $0xa8] sm:$0xff]  ;;  %v60_v32 = vld [vmem:[#allocation3 + $0xb0] sm:$0xff] }
  0x1b   :  { %170 = vadd.xlane.f32.xlu1 %v84_v11  ;;  %v76_v33 = vld [vmem:[#allocation3 + $0xb8] sm:$0xff]  ;;  %v91_v34 = vadd.f32 %v75_v31, %v59_v30  ;;  %v61_v36 = vld [vmem:[#allocation3 + $0xc0] sm:$0xff]  ;;  %v77_v37 = vld [vmem:[#allocation3 + $0xc8] sm:$0xff]  ;;  %p343_p12 = pnand %p342_p11, %p336_p8 }
  0x1c   :  { %v92_v35 = vadd.f32 %v76_v33, %v60_v32  ;;  %v62_v38 = vld [vmem:[#allocation3 + $0xd0] sm:$0xff]  ;;  %v78_v39 = vld [vmem:[#allocation3 + $0xd8] sm:$0xff]  ;;  %v93_v40 = vadd.f32 %v77_v37, %v61_v36  ;;  %v63_v42 = vld [vmem:[#allocation3 + $0xe0] sm:$0xff] }
  0x1d   :  { %v94_v41 = vadd.f32 %v78_v39, %v62_v38  ;;  %v79_v43 = vld [vmem:[#allocation3 + $0xe8] sm:$0xff]  ;;  %v64_v44 = vld [vmem:[#allocation3 + $0xf0] sm:$0xff]  ;;  %v80_v45 = vld [vmem:[#allocation3 + $0xf8] sm:$0xff] }
  0x1e   :  { %172 = vadd.xlane.f32.xlu0 %v85_v16  ;;  %v95_v46 = vadd.f32 %v79_v43, %v63_v42  ;;  %v96_v47 = vadd.f32 %v80_v45, %v64_v44  ;;  %v212_v51 = vld [vmem:[%s477_s1] sm:$0xff]  ;;  %v214_v53 = vld [vmem:[%s477_s1 + $0x10] sm:$0xff]  ;;  %v213_v54 = vld [vmem:[%s477_s1 + $0x8] sm:$0xff] }
  0x1f   :  { %174 = vadd.xlane.f32.xlu1 %v86_v17  ;;  %v215_v58 = vld [vmem:[%s477_s1 + $0x18] sm:$0xff]  ;;  %v216_v0 = vld [vmem:[%s477_s1 + $0x20] sm:$0xff]  ;;  %v217_v5 = vld [vmem:[%s477_s1 + $0x28] sm:$0xff] }
  0x20   :  { %v218_v14 = vld [vmem:[%s477_s1 + $0x30] sm:$0xff]  ;;  %v219_v18 = vld [vmem:[%s477_s1 + $0x38] sm:$0xff]  ;;  %v220_v26 = vld [vmem:[%s477_s1 + $0x40] sm:$0xff] }
  0x21   :  { %v221_v30 = vld [vmem:[%s477_s1 + $0x48] sm:$0xff]  ;;  %v222_v38 = vld [vmem:[%s477_s1 + $0x50] sm:$0xff]  ;;  %v223_v42 = vld [vmem:[%s477_s1 + $0x58] sm:$0xff] }
  0x22   :  { %176 = vadd.xlane.f32.xlu0 %v87_v22 }
  0x23   :  { %178 = vadd.xlane.f32.xlu1 %v88_v23 }
  0x26   :  { %180 = vadd.xlane.f32.xlu0 %v89_v28 }
  0x27   :  { %182 = vadd.xlane.f32.xlu1 %v90_v29 }
  0x2a   :  { %184 = vadd.xlane.f32.xlu0 %v91_v34 }
  0x2b   :  { %186 = vadd.xlane.f32.xlu1 %v92_v35 }
  0x2e   :  { %188 = vadd.xlane.f32.xlu0 %v93_v40 }
  0x2f   :  { %190 = vadd.xlane.f32.xlu1 %v94_v41 }
  0x32   :  { %192 = vadd.xlane.f32.xlu0 %v95_v46 }
  0x33   :  { %194 = vadd.xlane.f32.xlu1 %v96_v47 }
  0xa3   :  { %v165_v48 = vpop.xlane.xlu0 %164 }
  0xa4   :  { %v196_v49 = vmul.f32 0.00390625, %v165_v48  ;;  %v169_v50 = vpop.xlane.xlu1 %168 }
  0xa5   :  { %v198_v52 = vmul.f32 0.00390625, %v169_v50  ;;  %v224_v50 = vld [vmem:[%s477_s1 + $0x60] sm:$0xff] }
  0xa6   :  { %v228_v56 = vmul.f32 %v212_v51, %v196_v49 }
  0xa7   :  { %v167_v55 = vpop.xlane.xlu0 %166  ;;  %v230_v61 = vmul.f32 %v214_v53, %v198_v52 }
  0xa8   :  { %v197_v57 = vmul.f32 0.00390625, %v167_v55  ;;  %v171_v59 = vpop.xlane.xlu1 %170  ;;  %v245_v2 = vsel %vm244_vm0, %v228_v56, 0.0 }
  0xa9   :  { %v199_v60 = vmul.f32 0.00390625, %v171_v59  ;;  %v248_v9 = vsel %vm244_vm0, %v230_v61, 0.0 }
  0xaa   :  { %v229_v62 = vmul.f32 %v213_v54, %v197_v57  ;;  %v225_v54 = vld [vmem:[%s477_s1 + $0x68] sm:$0xff] }
  0xab   :  { %v231_v63 = vmul.f32 %v215_v58, %v199_v60  ;;  %v173_v1 = vpop.xlane.xlu0 %172 }
  0xac   :  { %v246_v3 = vsel %vm244_vm0, %v229_v62, 0.0  ;;  %v200_v4 = vmul.f32 0.00390625, %v173_v1  ;;  %v175_v6 = vpop.xlane.xlu1 %174  ;;  %v226_v62 = vld [vmem:[%s477_s1 + $0x70] sm:$0xff] }
  0xad   :  { %v247_v7 = vadd.f32 %v246_v3, %v245_v2  ;;  %v201_v8 = vmul.f32 0.00390625, %v175_v6  ;;  %v250_v10 = vsel %vm244_vm0, %v231_v63, 0.0  ;;  %v227_v2 = vld [vmem:[%s477_s1 + $0x78] sm:$0xff] }
  0xae   :  { %v232_v11 = vmul.f32 %v216_v0, %v200_v4 }
  0xaf   :  { %v249_v12 = vadd.f32 %v248_v9, %v247_v7  ;;  %v233_v13 = vmul.f32 %v217_v5, %v201_v8  ;;  %v177_v15 = vpop.xlane.xlu0 %176 }
  0xb0   :  { %v252_v16 = vsel %vm244_vm0, %v232_v11, 0.0  ;;  %v202_v17 = vmul.f32 0.00390625, %v177_v15  ;;  %v179_v19 = vpop.xlane.xlu1 %178 }
  0xb1   :  { %v251_v20 = vadd.f32 %v250_v10, %v249_v12  ;;  %v203_v21 = vmul.f32 0.00390625, %v179_v19  ;;  %v254_v22 = vsel %vm244_vm0, %v233_v13, 0.0 }
  0xb2   :  { %v234_v23 = vmul.f32 %v218_v14, %v202_v17 }
  0xb3   :  { %v253_v24 = vadd.f32 %v252_v16, %v251_v20  ;;  %v235_v25 = vmul.f32 %v219_v18, %v203_v21  ;;  %v181_v27 = vpop.xlane.xlu0 %180  ;;  %v282_v20 = vld [vmem:[%s478_s2] sm:$0x1] }
  0xb4   :  { %v256_v28 = vsel %vm244_vm0, %v234_v23, 0.0  ;;  %v204_v29 = vmul.f32 0.00390625, %v181_v27  ;;  %v183_v31 = vpop.xlane.xlu1 %182 }
  0xb5   :  { %v255_v32 = vadd.f32 %v254_v22, %v253_v24  ;;  %v205_v33 = vmul.f32 0.00390625, %v183_v31  ;;  %v258_v34 = vsel %vm244_vm0, %v235_v25, 0.0  ;;  %v284_v24 = vlaneseq }
  0xb6   :  { %v236_v35 = vmul.f32 %v220_v26, %v204_v29 }
  0xb7   :  { %v257_v36 = vadd.f32 %v256_v28, %v255_v32  ;;  %v237_v37 = vmul.f32 %v221_v30, %v205_v33  ;;  %v185_v39 = vpop.xlane.xlu0 %184  ;;  %v285_v25 = vand.u32 127, %v284_v24 }
  0xb8   :  { %v260_v40 = vsel %vm244_vm0, %v236_v35, 0.0  ;;  %v206_v41 = vmul.f32 0.00390625, %v185_v39  ;;  %v187_v43 = vpop.xlane.xlu1 %186 }
  0xb9   :  { %v259_v44 = vadd.f32 %v258_v34, %v257_v36  ;;  %v207_v45 = vmul.f32 0.00390625, %v187_v43  ;;  %v262_v46 = vsel %vm244_vm0, %v237_v37, 0.0  ;;  %vm286_vm1 = vcmp.lt.s32.totalorder %v285_v25, 8 }
  0xba   :  { %v238_v47 = vmul.f32 %v222_v38, %v206_v41 }
  0xbb   :  { %v261_v48 = vadd.f32 %v260_v40, %v259_v44  ;;  %v239_v49 = vmul.f32 %v223_v42, %v207_v45  ;;  %v189_v51 = vpop.xlane.xlu0 %188 }
  0xbc   :  { %v264_v52 = vsel %vm244_vm0, %v238_v47, 0.0  ;;  %v208_v53 = vmul.f32 0.00390625, %v189_v51  ;;  %v191_v55 = vpop.xlane.xlu1 %190 }
  0xbd   :  { %v263_v56 = vadd.f32 %v262_v46, %v261_v48  ;;  %v209_v57 = vmul.f32 0.00390625, %v191_v55  ;;  %v266_v58 = vsel %vm244_vm0, %v239_v49, 0.0 }
  0xbe   :  { %v240_v59 = vmul.f32 %v224_v50, %v208_v53 }
  0xbf   :  { %v265_v60 = vadd.f32 %v264_v52, %v263_v56  ;;  %v241_v61 = vmul.f32 %v225_v54, %v209_v57  ;;  %v193_v63 = vpop.xlane.xlu0 %192 }
  0xc0   :  { %v268_v0 = vsel %vm244_vm0, %v240_v59, 0.0  ;;  %v210_v1 = vmul.f32 0.00390625, %v193_v63  ;;  %v195_v3 = vpop.xlane.xlu1 %194 }
  0xc1   :  { %v267_v4 = vadd.f32 %v266_v58, %v265_v60  ;;  %v211_v5 = vmul.f32 0.00390625, %v195_v3  ;;  %v270_v6 = vsel %vm244_vm0, %v241_v61, 0.0 }
  0xc2   :  { %v242_v7 = vmul.f32 %v226_v62, %v210_v1 }
  0xc3   :  { %v269_v8 = vadd.f32 %v268_v0, %v267_v4  ;;  %v243_v9 = vmul.f32 %v227_v2, %v211_v5 }
  0xc4   :  { %v272_v10 = vsel %vm244_vm0, %v242_v7, 0.0 }
  0xc5   :  { %v271_v11 = vadd.f32 %v270_v6, %v269_v8  ;;  %v274_v12 = vsel %vm244_vm0, %v243_v9, 0.0 }
  0xc7   :  { %v273_v13 = vadd.f32 %v272_v10, %v271_v11 }
  0xc9   :  { %v275_v14 = vadd.f32 %v274_v12, %v273_v13 }
  0xcb   :  { %v276_v15 = vrot.slane %v275_v14, 4 }
  0xcd   :  { %v277_v16 = vadd.f32 %v276_v15, %v275_v14 }
  0xcf   :  { %v278_v17 = vrot.slane %v277_v16, 2 }
  0xd1   :  { %v279_v18 = vadd.f32 %v278_v17, %v277_v16 }
  0xd3   :  { %v280_v19 = vrot.slane %v279_v18, 1 }
  0xd5   :  { %v281_v21 = vadd.f32 %v280_v19, %v279_v18 }
  0xd7   :  { %v283_v22 = vadd.f32 %v282_v20, %v281_v21 }
  0xd9   :  { %v287_v23 = vmul.f32 1.442695, %v283_v22 }
  0xdb   :  { %311 = vpow2.f32 %v287_v23 }
  0xe5   :  { %v312_v26 = vpop.eup %311 }
  0xe6   :  { %v289_v27 = vsel %vm286_vm1, %v283_v22, %v312_v26 }
  0xe7   :  { %291 = vst.msk [vmem:[#allocation6] sm:$0x1] %vm290_vm2, %v289_v27 }
  0xe8   :  { %346 = shalt.err (!%p343_p12)
}
  0xe9   :  { %s347_s8 = scalar_lea.hbm %s479_s3, 16 }
  0xea   :  { %p348_p13 = scmp.ne.s32.totalorder %s479_s3, %s347_s8  ;;  %p351_p0 = scmp.lt.u32.totalorder %s347_s8, %s479_s3 }
  0xec   :  { %p353_p1 = pnand %p351_p0, %p348_p13 }
  0xee   :  { %356 = shalt.err (!%p353_p1)
}
  0xef   :  { %301 = dma.vmem_to_hbm [thread:$0]  %s299_s4, 16, %s479_s3, [#allocation5]  }
  0xf0   :  { %359 = dma.done.wait [#allocation5], 16  }
  0xf1   :  { %360 = vsyncadd [#allocation5], 4294967280 }
  0xf2   :  { %305 = vsyncpa [#allocation4], 1 }
  0xf3   :  { %306 = vsyncpa [#allocation5], 1 }

</bundles_post_ra>
